<compile_context>
chip_gen: v7x
topology: tpu7x:2x2x1
jax: 0.10.0
libtpu: 0.0.40
codegen_flags: <defaults>
</compile_context>

<pallas_src>
import jax
import jax.numpy as jnp
from jax.experimental import pallas as pl
from jax.experimental.pallas import tpu as pltpu


def attention_kernel(x_ref, w_ref, b_ref, o_ref):
    # x_ref: (TB, S, F), w_ref: (1, F), b_ref: (1, S), o_ref: (TB, F)
    # Upcast to f32 for the math (no-op for f32 inputs; needed on v5e for bf16).
    x = x_ref[...].astype(jnp.float32)               # (TB, S, F)
    w = w_ref[...].astype(jnp.float32)               # (1, F)
    b = b_ref[...].astype(jnp.float32)               # (1, S)

    # eij = x @ weight  -> N=1 projection stays OFF the MXU:
    # VPU multiply + lane reduce.
    eij = jnp.sum(x * w[:, None, :], axis=-1)        # (TB, S)
    eij = jnp.tanh(eij + b)                          # bias add in lane layout
    a = jnp.exp(eij)                                 # (TB, S), values in [1/e, e]

    # a = a / sum(a, step) + 1e-10  (epsilon AFTER the divide, as in torch).
    # Exact divide: the kernel is mem-bound, so this costs nothing and matches
    # the torch reference exactly.
    denom = jnp.sum(a, axis=-1, keepdims=True)       # (TB, 1)
    a = a / denom + 1e-10

    # Weighted sum over steps: VPU multiply + sublane (XLU) reduce.  An M=1
    # batched MXU matmul would waste >99% of the array and add drain latency.
    out = jnp.sum(x * a[:, :, None], axis=1)         # (TB, F)
    o_ref[...] = out.astype(o_ref.dtype)


def _vmem_plan():
    """Per-generation sizing: (x-block budget bytes, vmem_limit_bytes, #TensorCores)."""
    vmem_cap = None
    try:
        vmem_cap = int(pltpu.get_tpu_info().vmem_capacity_bytes)
    except Exception:
        vmem_cap = None

    if vmem_cap is not None and vmem_cap <= 80 * 1024 * 1024:
        # v7x-class: 64 MiB physical VMEM, 2 TensorCores per chip.
        # 2 x-blocks (double buffer) + ~1 block of temporaries must fit 48 MiB.
        return 14 * 1024 * 1024, 48 * 1024 * 1024, 2
    if vmem_cap is not None:
        # v5e / v6e: 128 MiB physical VMEM, 1 TensorCore.
        return 20 * 1024 * 1024, 64 * 1024 * 1024, 1
    # Unknown backend (e.g. interpret mode): conservative but still much
    # larger than the old 6 MiB budget.
    return 14 * 1024 * 1024, 48 * 1024 * 1024, 1


def _choose_batch_tile(B, S, F, itemsize, vmem_budget_bytes, num_cores):
    """Largest batch tile whose (tb,S,F) block fits the budget; sublane-legal,
    B-dividing when possible, and split across TensorCores only on multi-TC chips."""
    row_bytes = max(S * F * itemsize, 1)
    rows_fit = max(1, vmem_budget_bytes // row_bytes)
    tb = int(min(B, rows_fit))

    # Only on multi-TC chips (v7x) does a "parallel" grid axis shard across
    # cores: prefer >= num_cores equal steps when each half is still large
    # enough (>= 1 MiB) to amortize the ~0.35 us per-step overhead.
    if num_cores >= 2 and tb >= B and B >= num_cores:
        split = int(pl.cdiv(B, num_cores))
        if split * row_bytes >= (1 << 20):
            tb = split

    if tb < B:
        # Output block is (tb, F): its sublane dim must be a multiple of 8
        # (or the full B).  Round to a multiple of 8, clamping at 8.
        tb = max(8, tb - (tb % 8))
        tb = min(tb, B)
        if tb < B:
            # Prefer a tile that divides B: no masked partial last store and a
            # balanced shard on 2-TC chips.
            t = tb
            while t > 8 and B % t != 0:
                t -= 8
            if B % t == 0:
                tb = t
            elif B % 8 == 0:
                tb = 8
    return max(1, min(tb, B))


def attention_forward(x, weight, bias, *, batch_tile=None,
                      vmem_budget_bytes=None, vmem_limit_bytes=None):
    """x: (B, S, F), weight: (F, 1), bias: (S,). Returns (B, F)."""
    B, S, F = x.shape
    itemsize = jnp.dtype(x.dtype).itemsize

    budget, limit, num_cores = _vmem_plan()
    if vmem_budget_bytes is not None:
        budget = int(vmem_budget_bytes)
    if vmem_limit_bytes is not None:
        limit = int(vmem_limit_bytes)

    tb = batch_tile if batch_tile is not None else _choose_batch_tile(
        B, S, F, itemsize, budget, num_cores)
    tb = max(1, min(int(tb), B))
    grid = (pl.cdiv(B, tb),)

    w_row = weight.reshape(1, F)      # lane-major weight row for the VPU path
    b_row = bias.reshape(1, S)        # already in the layout eij is consumed in

    cost = pl.CostEstimate(
        flops=4 * B * S * F,                               # matvec + weighted sum
        transcendentals=2 * B * S,                         # tanh + exp
        bytes_accessed=(B * S * F + B * F + S + F) * itemsize,
    )

    return pl.pallas_call(
        attention_kernel,
        out_shape=jax.ShapeDtypeStruct((B, F), x.dtype),
        grid_spec=pltpu.PrefetchScalarGridSpec(
            num_scalar_prefetch=0,
            grid=grid,
            in_specs=[
                pl.BlockSpec((tb, S, F), lambda i: (i, 0, 0)),
                pl.BlockSpec((1, F), lambda i: (0, 0)),
                pl.BlockSpec((1, S), lambda i: (0, 0)),
            ],
            out_specs=pl.BlockSpec((tb, F), lambda i: (i, 0)),
        ),
        compiler_params=pltpu.CompilerParams(
            dimension_semantics=("parallel",),
            vmem_limit_bytes=int(limit),
        ),
        cost_estimate=cost,
    )(x, w_row, b_row)


def attention_reference(x, weight, bias):
    """Pure-JAX reference mirroring the torch forward exactly (mask=None)."""
    B, S, F = x.shape
    eij = (x.reshape(-1, F) @ weight).reshape(B, S)
    eij = eij + bias[None, :]
    eij = jnp.tanh(eij)
    a = jnp.exp(eij)
    a = a / jnp.sum(a, axis=1, keepdims=True) + 1e-10
    return jnp.sum(x * a[..., None], axis=1)


# TODO(synk): the optional `mask` argument of Attention.forward is not
# implemented; this kernel covers the mask=None path only.

if __name__ == "__main__":
    # Small shapes consistent with the module: batch=2, step_dim=8, feature_dim=32
    B, S, F = 2, 8, 32

    key = jax.random.PRNGKey(0)
    kx, kw = jax.random.split(key)

    x = jax.random.normal(kx, (B, S, F), dtype=jnp.float32)

    # Deterministic xavier-uniform-like init for weight (feature_dim, 1):
    # fan_in = 1, fan_out = feature_dim  ->  bound = sqrt(6 / (F + 1))
    bound = (6.0 / (F + 1)) ** 0.5
    weight = jax.random.uniform(kw, (F, 1), dtype=jnp.float32,
                                minval=-bound, maxval=bound)
    bias = jnp.zeros((S,), dtype=jnp.float32)   # torch.zeros(step_dim)

    out = attention_forward(x, weight, bias)
    out = jax.block_until_ready(out)

    ref = attention_reference(x, weight, bias)
    assert out.shape == (B, F)
    # All ops are exact now (no approx reciprocal); only summation-order noise.
    assert jnp.allclose(out, ref, atol=1e-4, rtol=1e-4), "mismatch vs reference"

    print("KERNEL_OK")
</pallas_src>

<mosaic_0001>
module attributes {stable_mosaic.version = 11 : i64} {
  func.func @attention_kernel(%arg0: i32, %arg1: memref<2x8x32xf32, #tpu.memory_space<vmem>>, %arg2: memref<1x32xf32, #tpu.memory_space<vmem>>, %arg3: memref<1x8xf32, #tpu.memory_space<vmem>>, %arg4: memref<2x32xf32, #tpu.memory_space<vmem>>) attributes {dimension_semantics = [#tpu.dimension_semantics<parallel>], iteration_bounds = array<i64: 1>, scalar_prefetch = 0 : i64, scratch_operands = 0 : i64, tpu.core_type = #tpu.core_type<tc>, window_params = [{transform_indices = @transform_0, window_bounds = array<i64: 2, 8, 32>}, {pipeline_mode = #tpu.pipeline_mode<synchronous>, transform_indices = @transform_1, window_bounds = array<i64: 1, 32>}, {pipeline_mode = #tpu.pipeline_mode<synchronous>, transform_indices = @transform_2, window_bounds = array<i64: 1, 8>}, {transform_indices = @transform_3, window_bounds = array<i64: 2, 32>}]} {
    %c0 = arith.constant 0 : index
    %c0_0 = arith.constant 0 : index
    %c0_1 = arith.constant 0 : index
    %0 = vector.load %arg1[%c0, %c0_0, %c0_1] : memref<2x8x32xf32, #tpu.memory_space<vmem>>, vector<2x8x32xf32>
    %c0_2 = arith.constant 0 : index
    %c0_3 = arith.constant 0 : index
    %1 = vector.load %arg2[%c0_2, %c0_3] : memref<1x32xf32, #tpu.memory_space<vmem>>, vector<1x32xf32>
    %c0_4 = arith.constant 0 : index
    %c0_5 = arith.constant 0 : index
    %2 = vector.load %arg3[%c0_4, %c0_5] : memref<1x8xf32, #tpu.memory_space<vmem>>, vector<1x8xf32>
    %3 = vector.shape_cast %1 : vector<1x32xf32> to vector<1x1x32xf32>
    %4 = vector.broadcast %3 : vector<1x1x32xf32> to vector<2x8x32xf32>
    %5 = arith.mulf %0, %4 : vector<2x8x32xf32>
    %cst = arith.constant dense<0.000000e+00> : vector<2x8xf32>
    %6 = vector.multi_reduction <add>, %5, %cst [2] : vector<2x8x32xf32> to vector<2x8xf32>
    %7 = vector.broadcast %2 : vector<1x8xf32> to vector<2x8xf32>
    %8 = arith.addf %6, %7 : vector<2x8xf32>
    %9 = math.tanh %8 : vector<2x8xf32>
    %10 = math.exp %9 : vector<2x8xf32>
    %cst_6 = arith.constant dense<0.000000e+00> : vector<2xf32>
    %11 = vector.multi_reduction <add>, %10, %cst_6 [1] : vector<2x8xf32> to vector<2xf32>
    %12 = vector.shape_cast %11 : vector<2xf32> to vector<2x1xf32>
    %13 = vector.broadcast %12 : vector<2x1xf32> to vector<2x8xf32>
    %14 = arith.divf %10, %13 : vector<2x8xf32>
    %cst_7 = arith.constant 1.000000e-10 : f32
    %15 = vector.broadcast %cst_7 : f32 to vector<2x8xf32>
    %16 = arith.addf %14, %15 : vector<2x8xf32>
    %17 = vector.shape_cast %16 : vector<2x8xf32> to vector<2x8x1xf32>
    %18 = vector.broadcast %17 : vector<2x8x1xf32> to vector<2x8x32xf32>
    %19 = arith.mulf %0, %18 : vector<2x8x32xf32>
    %cst_8 = arith.constant dense<0.000000e+00> : vector<2x32xf32>
    %20 = vector.multi_reduction <add>, %19, %cst_8 [1] : vector<2x8x32xf32> to vector<2x32xf32>
    %c0_9 = arith.constant 0 : index
    %c0_10 = arith.constant 0 : index
    %21 = vector.load %arg4[%c0_9, %c0_10] : memref<2x32xf32, #tpu.memory_space<vmem>>, vector<2x32xf32>
    tpu.vector_store %arg4[%c0_9, %c0_10], %20 {strides = array<i32>} : memref<2x32xf32, #tpu.memory_space<vmem>>, vector<2x32xf32>,
    return
  }
  func.func @transform_0(%arg0: i32) -> (i32, i32, i32) {
    %c0_i32 = arith.constant 0 : i32
    %c0_i32_0 = arith.constant 0 : i32
    %c0_i32_1 = arith.constant 0 : i32
    return %arg0, %c0_i32, %c0_i32_0 : i32, i32, i32
  }
  func.func @transform_1(%arg0: i32) -> (i32, i32) {
    %c0_i32 = arith.constant 0 : i32
    %c0_i32_0 = arith.constant 0 : i32
    %c0_i32_1 = arith.constant 0 : i32
    return %c0_i32, %c0_i32_0 : i32, i32
  }
  func.func @transform_2(%arg0: i32) -> (i32, i32) {
    %c0_i32 = arith.constant 0 : i32
    %c0_i32_0 = arith.constant 0 : i32
    %c0_i32_1 = arith.constant 0 : i32
    return %c0_i32, %c0_i32_0 : i32, i32
  }
  func.func @transform_3(%arg0: i32) -> (i32, i32) {
    %c0_i32 = arith.constant 0 : i32
    %c0_i32_0 = arith.constant 0 : i32
    return %arg0, %c0_i32 : i32, i32
  }
}

</mosaic_0001>

<bundles_post_ra>
// kernel: tpu_custom_call.1
= control target key start
LH: loop header
LB: loop body
LE: loop exit
PB: predicated region body
PF: predicated region fallthrough
CT: control target
= control target key end

     0   :  { %8 = vsyncpa [#allocation3], 0  ;;  %s284_s0 = inlined_call_operand.hbm [shape: f32[2,8,32], index: 0, kind: input, shape index: {}]   ;;  %s285_s1 = inlined_call_operand.vmem [shape: f32[1,32], index: 1, kind: input, shape index: {}]   ;;  %s286_s2 = inlined_call_operand.vmem [shape: f32[1,8], index: 2, kind: input, shape index: {}]   ;;  %s287_s3 = inlined_call_operand.hbm [shape: f32[2,32], index: 3, kind: output, shape index: {}]  }
   0x1   :  { %9 = vsyncpa [#allocation4], 0  ;;  %s223_s12 = smov [#allocation2]   ;;  %s175_s16 = scalar_lea.hbm %s284_s0, 256 }
   0x2   :  { %s15_s13 = sshll.u32 %s223_s12, 4  ;;  %p176_p0 = scmp.ne.s32.totalorder %s284_s0, %s175_s16  ;;  %s16_s13 = int_to_ptr.vmem [resolvable:$true] %s15_s13 }
   0x3   :  { %p179_p1 = scmp.lt.u32.totalorder %s175_s16, %s284_s0 }
   0x5   :  { %p181_p2 = pnand %p179_p1, %p176_p0 }
   0x7   :  { %184 = shalt.err (!%p181_p2)
}
   0x8   :  { %s185_s21 = scalar_lea.vmem %s16_s13, 256  ;;  %p190_p4 = scmp.lt.s32.totalorder %s16_s13, %s16_s13 }
   0x9   :  { %p186_p3 = scmp.ne.s32.totalorder %s16_s13, %s185_s21  ;;  %p191_p5 = scmp.lt.s32.totalorder %s185_s21, %s185_s21 }
   0xb   :  { %p192_p6 = por %p191_p5, %p190_p4 }
   0xd   :  { %p193_p7 = pnand %p192_p6, %p186_p3 }
   0xf   :  { %196 = shalt.err (!%p193_p7)
}
  0x10   :  { %s224_s22 = smov 128   ;;  %s225_s23 = smov 8  }
  0x11   :  { %21 = dma.hbm_to_vmem [thread:$0]  %s284_s0, 256, %s16_s13, [#allocation3], %s224_s22, %s224_s22, %s225_s23  }
  0x12   :  { %219 = dma.done.wait [#allocation3], 256  }
  0x13   :  { %220 = vsyncadd [#allocation3], 4294967040  ;;  %v29_v0 = vld [vmem:[#allocation2] sm:$0xff]  ;;  %vm41_vm0 = vcmask 261120   ;;  %v30_v2 = vld [vmem:[#allocation2 + $0x8] sm:$0xff]  ;;  %v226_v8 = vmov 0   ;;  %v73_v20 = vlaneseq }
  0x14   :  { %v154_v1 = vld [vmem:[%s285_s1] ss:$0 sm:$0xff]  ;;  %161 = vset.pattern.permute.xlu1 %v226_v8  ;;  %162 = vset.pattern.permute.xlu0 %v226_v8  ;;  %vm83_vm1 = vcmask 1041409   ;;  %vm86_vm2 = vcmask 58368   ;;  %s227_s0 = smov [#allocation5]   ;;  %vm137_vm3 = vcmask 254976  }
  0x15   :  { %v39_v3 = vmul.f32 %v154_v1, %v29_v0  ;;  %v40_v4 = vmul.f32 %v154_v1, %v30_v2  ;;  %v155_v5 = vld [vmem:[%s286_s2] ss:$0 sm:$0xff]  ;;  %v74_v21 = vand.u32 127, %v73_v20  ;;  %v76_v22 = vshrl.u32 %v73_v20, 7  ;;  %s145_s1 = sshll.u32 %s227_s0, 4  ;;  %s146_s1 = int_to_ptr.vmem [resolvable:$true] %s145_s1 }
  0x16   :  { %54 = vbcast.lane.b32.xlu1 %v155_v5, 256  ;;  %s197_s2 = scalar_lea.vmem %s146_s1, 32  ;;  %p202_p9 = scmp.lt.s32.totalorder %s146_s1, %s146_s1 }
  0x17   :  { %v42_v6 = vsel %vm41_vm0, %v39_v3, 0.0  ;;  %v45_v7 = vsel %vm41_vm0, %v40_v4, 0.0  ;;  %v77_v23 = vsub.s32 %v74_v21, %v76_v22  ;;  %v93_v30 = vsub.s32 0, %v76_v22  ;;  %p198_p8 = scmp.ne.s32.totalorder %s146_s1, %s197_s2  ;;  %p203_p10 = scmp.lt.s32.totalorder %s197_s2, %s197_s2 }
  0x18   :  { %43 = vadd.xlane.f32.xlu0 %v42_v6  ;;  %v97_v31 = vsub.s32 1, %v76_v22 }
  0x19   :  { %p204_p11 = por %p203_p10, %p202_p9 }
  0x1b   :  { %p205_p12 = pnand %p204_p11, %p198_p8 }
  0x1c   :  { %46 = vadd.xlane.f32.xlu0 %v45_v7 }
  0x88   :  { %v55_v9 = vpop.permute.xlu1 %54 }
  0xa5   :  { %v44_v10 = vpop.xlane.xlu0 %43 }
  0xa6   :  { %v57_v11 = vadd.f32 %v55_v9, %v44_v10 }
  0xa8   :  { %163 = vtanh.f32 %v57_v11 }
  0xa9   :  { %v47_v12 = vpop.xlane.xlu0 %46 }
  0xaa   :  { %v58_v13 = vadd.f32 %v55_v9, %v47_v12 }
  0xac   :  { %165 = vtanh.f32 %v58_v13 }
  0xb2   :  { %v164_v14 = vpop.eup %163 }
  0xb3   :  { %v61_v15 = vmul.f32 1.442695, %v164_v14 }
  0xb5   :  { %167 = vpow2.f32 %v61_v15 }
  0xb6   :  { %v166_v16 = vpop.eup %165 }
  0xb7   :  { %v63_v17 = vmul.f32 1.442695, %v166_v16 }
  0xb9   :  { %169 = vpow2.f32 %v63_v17 }
  0xbf   :  { %v168_v18 = vpop.eup %167 }
  0xc0   :  { %68 = vperm.xlu1 %161, %v168_v18  }
  0xc3   :  { %v170_v19 = vpop.eup %169 }
  0xc4   :  { %71 = vperm.xlu0 %162, %v170_v19  }
 0x13f   :  { %v69_v24 = vpop.permute.xlu1 %68 }
 0x140   :  { %v78_v26 = vrot.slane %v69_v24, %v77_v23 }
 0x143   :  { %v72_v25 = vpop.permute.xlu0 %71 }
 0x144   :  { %v82_v27 = vrot.slane %v72_v25, %v77_v23 }
 0x146   :  { %v84_v28 = vsel %vm83_vm1, %v82_v27, %v78_v26 }
 0x147   :  { %v87_v29 = vsel %vm86_vm2, %v84_v28, 0.0 }
 0x148   :  { %88 = vadd.xlane.f32.xlu1 %v87_v29 }
 0x1d5   :  { %v89_v32 = vpop.xlane.xlu1 %88 }
 0x1d6   :  { %v94_v33 = vrot.slane %v89_v32, %v93_v30  ;;  %v98_v34 = vrot.slane %v89_v32, %v97_v31 }
 0x1d8   :  { %171 = vrcp.f32 %v94_v33 }
 0x1d9   :  { %173 = vrcp.f32 %v98_v34 }
 0x1e2   :  { %v172_v35 = vpop.eup %171 }
 0x1e3   :  { %v174_v36 = vpop.eup %173  ;;  %v102_v37 = vmul.f32 %v172_v35, %v168_v18 }
 0x1e4   :  { %v104_v38 = vmul.f32 %v174_v36, %v170_v19 }
 0x1e5   :  { %v105_v39 = vadd.f32 1e-10, %v102_v37 }
 0x1e6   :  { %v106_v40 = vadd.f32 1e-10, %v104_v38 }
 0x1e7   :  { %109 = vperm.xlu1 %161, %v105_v39  }
 0x1e8   :  { %114 = vperm.xlu0 %162, %v106_v40  }
 0x266   :  { %v110_v41 = vpop.permute.xlu1 %109 }
 0x267   :  { %v115_v42 = vpop.permute.xlu0 %114  ;;  %v117_v43 = vmul.f32 %v110_v41, %v29_v0 }
 0x268   :  { %v118_v44 = vmul.f32 %v115_v42, %v30_v2 }
 0x269   :  { %v119_v45 = vsel %vm41_vm0, %v117_v43, 0.0 }
 0x26a   :  { %v126_v46 = vsel %vm41_vm0, %v118_v44, 0.0  ;;  %v120_v47 = vrot.slane %v119_v45, 4 }
 0x26b   :  { %v127_v48 = vrot.slane %v126_v46, 4 }
 0x26c   :  { %v121_v49 = vadd.f32 %v120_v47, %v119_v45 }
 0x26d   :  { %v128_v50 = vadd.f32 %v127_v48, %v126_v46 }
 0x26e   :  { %v122_v51 = vrot.slane %v121_v49, 2 }
 0x26f   :  { %v129_v52 = vrot.slane %v128_v50, 2 }
 0x270   :  { %v123_v53 = vadd.f32 %v122_v51, %v121_v49 }
 0x271   :  { %v130_v54 = vadd.f32 %v129_v52, %v128_v50 }
 0x272   :  { %v124_v55 = vrot.slane %v123_v53, 1 }
 0x273   :  { %v131_v56 = vrot.slane %v130_v54, 1 }
 0x274   :  { %v125_v57 = vadd.f32 %v124_v55, %v123_v53 }
 0x275   :  { %v132_v58 = vadd.f32 %v131_v56, %v130_v54 }
 0x277   :  { %v135_v59 = vsel %vm83_vm1, %v132_v58, %v125_v57 }
 0x278   :  { %138 = vst.msk [vmem:[#allocation5] sm:$0x3] %vm137_vm3, %v135_v59 }
 0x279   :  { %208 = shalt.err (!%p205_p12)
}
 0x27a   :  { %s209_s5 = scalar_lea.hbm %s287_s3, 32 }
 0x27b   :  { %p210_p13 = scmp.ne.s32.totalorder %s287_s3, %s209_s5  ;;  %p213_p0 = scmp.lt.u32.totalorder %s209_s5, %s287_s3 }
 0x27d   :  { %p215_p1 = pnand %p213_p0, %p210_p13 }
 0x27f   :  { %218 = shalt.err (!%p215_p1)
}
 0x280   :  { %148 = dma.vmem_to_hbm [thread:$0]  %s146_s1, 32, %s287_s3, [#allocation4]  }
 0x281   :  { %221 = dma.done.wait [#allocation4], 32  }
 0x282   :  { %222 = vsyncadd [#allocation4], 4294967264 }
 0x283   :  { %152 = vsyncpa [#allocation3], 1 }
 0x284   :  { %153 = vsyncpa [#allocation4], 1 }

</bundles_post_ra>
